<compile_context>
chip_gen: v6e
topology: v6e:2x2x1
jax: 0.10.0
libtpu: 0.0.40
codegen_flags: <defaults>
</compile_context>

<pallas_src>
import jax
import jax.numpy as jnp
import numpy as np
from jax import lax
from jax.experimental import pallas as pl
from jax.experimental.pallas import tpu as pltpu

EPS = 1e-5


def _round_up(x, m):
    return (x + m - 1) // m * m


def _hw_budgets():
    """Per-generation VMEM limits / tile caps (conservative v7x defaults if unknown)."""
    vmem_cap = None
    try:
        info = pltpu.get_tpu_info()
        vmem_cap = int(getattr(info, "vmem_capacity_bytes", 0)) or None
    except Exception:
        vmem_cap = None
    if vmem_cap is not None and vmem_cap >= 100 * 1024 * 1024:
        # v5e / v6e: 128 MiB physical VMEM -> bigger scoped limit, bigger lane tiles.
        return dict(vmem_limit=64 << 20, block_budget=40 << 20, max_tile=2048, min_steps=2)
    # v7x (64 MiB physical, 2 TCs sharing the grid) or unknown: stay conservative and make
    # sure each TensorCore gets >= 2 pipelined grid steps.
    return dict(vmem_limit=32 << 20, block_budget=24 << 20, max_tile=1024, min_steps=4)


def _choose_tile(nhw, per_lane_bytes, block_budget, max_tile, min_steps):
    """Largest power-of-two multiple of 128 that fits the VMEM budget and keeps >= min_steps
    grid steps (when NHW is big enough)."""
    cap = max_tile
    cap = min(cap, max(128, block_budget // max(per_lane_bytes, 1)))
    steps_cap = max(128, (_round_up(nhw, 128) // min_steps) // 128 * 128)
    cap = min(cap, steps_cap)
    tile = 128
    while tile * 2 <= cap:
        tile *= 2
    return tile


def conv_stats_kernel(patch_ref, w_ref, raw_ref, psum_ref):
    """Fused-tap transposed conv (single MXU matmul) + per-tile BN partial sums.

    patch_ref : (Kp, TILE)   im2col'd padded input; lanes = output-pixel index (n*H*W + a*W + b)
    w_ref     : (Mp, Kp)     packed weight; row m = (2*pp + qq)*OC + oc
    raw_ref   : (Mp, TILE)   un-normalized, bias-free conv output (lane-dense store)
    psum_ref  : (1, Mp, 2)   this tile's [sum, sum-of-squares] per row
    """
    raw = jnp.dot(w_ref[...], patch_ref[...], preferred_element_type=jnp.float32)
    raw_ref[...] = raw
    psum_ref[0, :, 0:1] = jnp.sum(raw, axis=1, keepdims=True)
    psum_ref[0, :, 1:2] = jnp.sum(raw * raw, axis=1, keepdims=True)


def decoder_single_block_2(x, skip_x, w_t, bias, gamma, beta, *, compute_dtype=jnp.float32):
    """x: (N, C, H, W), skip_x: (N, Cs, 2H, 2W), w_t: (C, OC, 4, 4) (PyTorch layouts).

    `bias` is accepted for API parity but intentionally unused: the training-mode BatchNorm
    that immediately follows subtracts the per-channel batch mean, which absorbs any
    per-channel pre-BN bias exactly (identical forward-pass semantics).
    """
    del bias  # absorbed by BN mean subtraction (see docstring)
    N, C, H, W = x.shape
    OC = w_t.shape[1]
    NHW = N * H * W
    M = 4 * OC                       # (parity pp,qq) x (out channel) rows
    K = 9 * C                        # 3x3 shift taps x in channels
    Mp = _round_up(M, 8)             # sublane-aligned row count (keep 8, NOT 128: HBM-bound)
    Kp = _round_up(K, 8)             # sublane-aligned contraction

    hw = _hw_budgets()
    patch_isz = jnp.dtype(compute_dtype).itemsize
    # Double-buffered (Kp x TILE) patch block in + (Mp x TILE) f32 raw block out per step.
    per_lane_bytes = 2 * (Kp * patch_isz + Mp * 4)
    TILE = _choose_tile(NHW, per_lane_bytes, hw["block_budget"], hw["max_tile"], hw["min_steps"])
    T = pl.cdiv(NHW, TILE)
    NHWp = T * TILE                  # lane-padded pixel count (pad lanes stay exactly zero)

    # ---- wrapper glue: layout plumbing (XLA) --------------------------------------------
    # Zero-pad spatially and gather the 3x3 tap neighborhood (im2col-lite), putting the
    # output-pixel axis last so every kernel load/store is lane-dense and unmasked.
    x_pad = jnp.pad(x, ((0, 0), (0, 0), (1, 1), (1, 1)))            # (N, C, H+2, W+2)
    taps = [x_pad[:, :, sh:sh + H, sw:sw + W]                       # (N, C, H, W)
            for sh in range(3) for sw in range(3)]
    patch = jnp.stack(taps, axis=0)                                 # (9, N, C, H, W)
    patch = jnp.transpose(patch, (0, 2, 1, 3, 4)).reshape(K, NHW)   # (9*C, NHW)
    patch = jnp.pad(patch, ((0, Kp - K), (0, NHWp - NHW)))          # (Kp, NHWp)
    patch = patch.astype(compute_dtype)

    # Pack the ConvTranspose2d weight:
    #   out[2a+pp, 2b+qq] = sum_{dh,dw in {0,1}} x_pad[a+pp+dh, b+qq+dw] . w_t[:,:,3-pp-2dh,3-qq-2dw]
    # Row m = (2*pp+qq)*OC + oc, column k = ((pp+dh)*3 + (qq+dw))*C + c; unused taps stay zero,
    # so all 4 output parities come out of ONE MXU matmul per lane tile.
    w_big = jnp.zeros((Mp, Kp), jnp.float32)
    for pp in (0, 1):
        for qq in (0, 1):
            m0 = (2 * pp + qq) * OC
            for dh in (0, 1):
                for dw in (0, 1):
                    k0 = ((pp + dh) * 3 + (qq + dw)) * C
                    kh, kw = 3 - pp - 2 * dh, 3 - qq - 2 * dw
                    w_big = w_big.at[m0:m0 + OC, k0:k0 + C].set(
                        jnp.transpose(w_t[:, :, kh, kw]).astype(jnp.float32))
    w_big = w_big.astype(compute_dtype)

    cparams = pltpu.CompilerParams(dimension_semantics=("parallel",),
                                   vmem_limit_bytes=hw["vmem_limit"])

    # ---- single pass: transposed conv and per-tile BN partial sums ----------------------
    raw, psum = pl.pallas_call(
        conv_stats_kernel,
        out_shape=(jax.ShapeDtypeStruct((Mp, NHWp), jnp.float32),
                   jax.ShapeDtypeStruct((T, Mp, 2), jnp.float32)),
        grid=(T,),
        in_specs=[pl.BlockSpec((Kp, TILE), lambda t: (0, t)),
                  pl.BlockSpec((Mp, Kp), lambda t: (0, 0))],
        out_specs=(pl.BlockSpec((Mp, TILE), lambda t: (0, t)),
                   pl.BlockSpec((1, Mp, 2), lambda t: (t, 0, 0))),
        compiler_params=cparams,
    )(patch, w_big)

    # Tiny O(OC) batch-stat math (training-mode BN, biased variance) — wrapper glue.
    # Zero pad lanes contribute nothing to the sums (no bias), and count uses the true NHW.
    sums = jnp.sum(psum, axis=0)[:M]                        # (M, 2)
    s1 = jnp.sum(sums[:, 0].reshape(4, OC), axis=0)         # per-channel sum
    s2 = jnp.sum(sums[:, 1].reshape(4, OC), axis=0)         # per-channel sum of squares
    count = 4.0 * NHW                                       # N * 2H * 2W elements per channel
    mean = s1 / count
    var = jnp.maximum(s2 / count - mean * mean, 0.0)
    scale = gamma * lax.rsqrt(var + EPS)
    shift = beta - mean * scale

    # ---- wrapper glue: BN affine folded into the parity re-interleave, then concat -------
    scale_rows = jnp.tile(scale, 4).reshape(M, 1).astype(jnp.float32)
    shift_rows = jnp.tile(shift, 4).reshape(M, 1).astype(jnp.float32)
    y = raw[:M, :NHW] * scale_rows + shift_rows             # fused by XLA into the copy below
    y = y.reshape(2, 2, OC, N, H, W)                        # (pp, qq, oc, n, a, b)
    y = jnp.transpose(y, (3, 2, 4, 0, 5, 1)).reshape(N, OC, 2 * H, 2 * W)
    return jnp.concatenate([y, skip_x], axis=1)


def reference(x, skip_x, w_t, bias, gamma, beta):
    """Pure-JAX reference (lax conv-transpose + batch-stat BN + concat)."""
    w_conv = jnp.transpose(w_t[:, :, ::-1, ::-1], (1, 0, 2, 3))     # (OC, C, 4, 4)
    y = lax.conv_general_dilated(x, w_conv, window_strides=(1, 1),
                                 padding=[(2, 2), (2, 2)], lhs_dilation=(2, 2),
                                 dimension_numbers=('NCHW', 'OIHW', 'NCHW'))
    y = y + bias[None, :, None, None]
    mean = jnp.mean(y, axis=(0, 2, 3), keepdims=True)
    var = jnp.var(y, axis=(0, 2, 3), keepdims=True)
    y = (y - mean) / jnp.sqrt(var + EPS)
    y = y * gamma[None, :, None, None] + beta[None, :, None, None]
    return jnp.concatenate([y, skip_x], axis=1)


if __name__ == "__main__":
    key = jax.random.PRNGKey(0)
    k1, k2, k3, k4, k5, k6 = jax.random.split(key, 6)

    N, C, H, W = 2, 8, 32, 32        # input_channels = 8 -> OC = 2; NHW = 2048
    OC = C // 4
    Cs = OC                          # typical UNet skip width

    x = jax.random.normal(k1, (N, C, H, W), jnp.float32)
    skip_x = jax.random.normal(k2, (N, Cs, 2 * H, 2 * W), jnp.float32)

    # deterministic parameter init (synthetic, not a checkpoint)
    w_t = 0.1 * jax.random.normal(k3, (C, OC, 4, 4), jnp.float32)   # (in, out, kH, kW)
    bias = 0.1 * jax.random.normal(k4, (OC,), jnp.float32)
    gamma = 1.0 + 0.1 * jax.random.normal(k5, (OC,), jnp.float32)
    beta = 0.1 * jax.random.normal(k6, (OC,), jnp.float32)

    out = jax.block_until_ready(decoder_single_block_2(x, skip_x, w_t, bias, gamma, beta))
    ref = jax.block_until_ready(reference(x, skip_x, w_t, bias, gamma, beta))

    assert out.shape == (N, OC + Cs, 2 * H, 2 * W)
    np.testing.assert_allclose(np.asarray(out), np.asarray(ref), atol=1e-3, rtol=1e-3)
    print("KERNEL_OK")
</pallas_src>

<mosaic_0001>
module attributes {stable_mosaic.version = 11 : i64} {
  func.func @conv_stats_kernel(%arg0: i32, %arg1: memref<72x512xf32, #tpu.memory_space<vmem>>, %arg2: memref<8x72xf32, #tpu.memory_space<vmem>>, %arg3: memref<8x512xf32, #tpu.memory_space<vmem>>, %arg4: memref<1x8x2xf32, #tpu.memory_space<vmem>>) attributes {dimension_semantics = [#tpu.dimension_semantics<parallel>], iteration_bounds = array<i64: 4>, scalar_prefetch = 0 : i64, scratch_operands = 0 : i64, tpu.core_type = #tpu.core_type<tc>, window_params = [{transform_indices = @transform_0, window_bounds = array<i64: 72, 512>}, {pipeline_mode = #tpu.pipeline_mode<synchronous>, transform_indices = @transform_1, window_bounds = array<i64: 8, 72>}, {transform_indices = @transform_2, window_bounds = array<i64: 8, 512>}, {transform_indices = @transform_3, window_bounds = array<i64: 1, 8, 2>}]} {
    %c0 = arith.constant 0 : index
    %c0_0 = arith.constant 0 : index
    %0 = vector.load %arg2[%c0, %c0_0] : memref<8x72xf32, #tpu.memory_space<vmem>>, vector<8x72xf32>
    %c0_1 = arith.constant 0 : index
    %c0_2 = arith.constant 0 : index
    %1 = vector.load %arg1[%c0_1, %c0_2] : memref<72x512xf32, #tpu.memory_space<vmem>>, vector<72x512xf32>
    %cst = arith.constant dense<0.000000e+00> : vector<8x512xf32>
    %2 = tpu.matmul %0, %1, %cst {dimension_numbers = #tpu.dot_dimension_numbers<[1], [0], [0], [1], [0, 0, 1, 1], [], []>} : vector<8x72xf32>, vector<72x512xf32>, vector<8x512xf32> -> vector<8x512xf32>
    %c0_3 = arith.constant 0 : index
    %c0_4 = arith.constant 0 : index
    %3 = vector.load %arg3[%c0_3, %c0_4] : memref<8x512xf32, #tpu.memory_space<vmem>>, vector<8x512xf32>
    tpu.vector_store %arg3[%c0_3, %c0_4], %2 {strides = array<i32>} : memref<8x512xf32, #tpu.memory_space<vmem>>, vector<8x512xf32>,
    %cst_5 = arith.constant dense<0.000000e+00> : vector<8xf32>
    %4 = vector.multi_reduction <add>, %2, %cst_5 [1] : vector<8x512xf32> to vector<8xf32>
    %5 = vector.shape_cast %4 : vector<8xf32> to vector<8x1xf32>
    %c0_6 = arith.constant 0 : index
    %c0_7 = arith.constant 0 : index
    %c0_8 = arith.constant 0 : index
    %6 = vector.load %arg4[%c0_6, %c0_7, %c0_8] : memref<1x8x2xf32, #tpu.memory_space<vmem>>, vector<1x8x1xf32>
    %7 = vector.shape_cast %6 : vector<1x8x1xf32> to vector<8x1xf32>
    %8 = vector.shape_cast %5 : vector<8x1xf32> to vector<1x8x1xf32>
    tpu.vector_store %arg4[%c0_6, %c0_7, %c0_8], %8 {strides = array<i32>} : memref<1x8x2xf32, #tpu.memory_space<vmem>>, vector<1x8x1xf32>,
    %9 = arith.mulf %2, %2 : vector<8x512xf32>
    %cst_9 = arith.constant dense<0.000000e+00> : vector<8xf32>
    %10 = vector.multi_reduction <add>, %9, %cst_9 [1] : vector<8x512xf32> to vector<8xf32>
    %11 = vector.shape_cast %10 : vector<8xf32> to vector<8x1xf32>
    %c0_10 = arith.constant 0 : index
    %c0_11 = arith.constant 0 : index
    %c1 = arith.constant 1 : index
    %12 = vector.load %arg4[%c0_10, %c0_11, %c1] : memref<1x8x2xf32, #tpu.memory_space<vmem>>, vector<1x8x1xf32>
    %13 = vector.shape_cast %12 : vector<1x8x1xf32> to vector<8x1xf32>
    %14 = vector.shape_cast %11 : vector<8x1xf32> to vector<1x8x1xf32>
    tpu.vector_store %arg4[%c0_10, %c0_11, %c1], %14 {strides = array<i32>} : memref<1x8x2xf32, #tpu.memory_space<vmem>>, vector<1x8x1xf32>,
    return
  }
  func.func @transform_0(%arg0: i32) -> (i32, i32) {
    %c0_i32 = arith.constant 0 : i32
    %c0_i32_0 = arith.constant 0 : i32
    return %c0_i32, %arg0 : i32, i32
  }
  func.func @transform_1(%arg0: i32) -> (i32, i32) {
    %c0_i32 = arith.constant 0 : i32
    %c0_i32_0 = arith.constant 0 : i32
    %c0_i32_1 = arith.constant 0 : i32
    return %c0_i32, %c0_i32_0 : i32, i32
  }
  func.func @transform_2(%arg0: i32) -> (i32, i32) {
    %c0_i32 = arith.constant 0 : i32
    %c0_i32_0 = arith.constant 0 : i32
    return %c0_i32, %arg0 : i32, i32
  }
  func.func @transform_3(%arg0: i32) -> (i32, i32, i32) {
    %c0_i32 = arith.constant 0 : i32
    %c0_i32_0 = arith.constant 0 : i32
    %c0_i32_1 = arith.constant 0 : i32
    return %arg0, %c0_i32, %c0_i32_0 : i32, i32, i32
  }
}

</mosaic_0001>

<bundles_post_ra>
// kernel: tpu_custom_call.1
= control target key start
LH: loop header
LB: loop body
LE: loop exit
PB: predicated region body
PF: predicated region fallthrough
CT: control target
= control target key end

     0   :  { %9 = vsyncpa [#allocation3], 0  ;;  %s988_s0 = inlined_call_operand.hbm [shape: f32[72,2048], index: 0, kind: input, shape index: {}]   ;;  %s989_s1 = inlined_call_operand.hbm [shape: f32[8,72], index: 1, kind: input, shape index: {}]   ;;  %s990_s2 = inlined_call_operand.hbm [shape: f32[8,2048], index: 2, kind: output, shape index: {0}]   ;;  %s991_s3 = inlined_call_operand.vmem [shape: f32[4,8,2], index: 3, kind: output, shape index: {1}]  }
   0x1   :  { %11 = vsyncpa [#allocation3 + $0x1], 0 }
   0x2   :  { %12 = vsyncpa [#allocation6], 0 }
   0x3   :  { %13 = vsyncpa [#allocation4], 0 }
   0x4   :  { %15 = vsyncpa [#allocation4 + $0x1], 0  ;;  %s779_s12 = smov 0   ;;  %s781_s13 = smov 0  }
   0x5   :  { %s783_s14 = smov 0   ;;  %s785_s15 = smov 0  }
   0x6 LB: > { %s800_s16 = sadd.s32 4294967295, %s750_s15   ;;  %s546_s17 = sadd.s32 4294967294, %s750_s15   ;;  %s750_s15 = sphi %s785_s15, %s1012_s15   ;;  %s746_s14 = sphi %s783_s14, %s1011_s14   ;;  %s742_s13 = sphi %s781_s13, %s1010_s13   ;;  %s738_s12 = sphi %s779_s12, %s1009_s12  }
   0x7   : > { %s804_s18 = sadd.s32 1, %s750_s15   ;;  %s28_s19 = sadd.s32 1, %s746_s14 }
   0x8   : > { %s25_s20 = ssub.s32 %s750_s15, %s804_s18  ;;  %p35_p0 = scmp.ne.s32.totalorder %s746_s14, %s742_s13 }
   0x9   : > { %p26_p1 = scmp.eq.s32.totalorder %s25_s20, 0  ;;  %p36_p2 = scmp.eq.s32.totalorder %s750_s15, 0 }
   0xa   : > { %p41_p3 = scmp.ne.s32.totalorder %s742_s13, %s738_s12  ;;  %p993_p4 = scmp.eq.s32.totalorder %s800_s16, 0 }
   0xb   : > { %s816_s21 = scalar_select %p26_p1, %s746_s14, %s28_s19  }
   0xc   : > { %p818_p5 = por %p36_p2, %p35_p0  ;;  %p824_p6 = por %p993_p4, %p41_p3 }
   0xd   : > { %p86_p7 = scmp.eq.s32.totalorder %s800_s16, 3  ;;  %p92_p8 = scmp.eq.s32.totalorder %s546_s17, 3 }
   0xe   : > { %s997_s23 = scalar_select %p824_p6, 1, 0 }
   0xf   : > { %p547_p9 = scmp.ge.s32.totalorder %s750_s15, 1  ;;  %p125_p10 = scmp.lt.s32.totalorder %s750_s15, 5 }
  0x10   : > { %p831_p11 = por %p86_p7, %p35_p0  ;;  %p835_p12 = por %p92_p8, %p41_p3 }
  0x11   : > { %p839_p13 = pnand %p547_p9, %p125_p10  ;;  %s752_s27 = smov [#allocation5]  }
  0x12   : > { %s998_s24 = scalar_select %p831_p11, 1, 0 }
  0x13   : > { %s999_s25 = scalar_select %p835_p12, 1, 0 }
  0x14   : > { %s1000_s26 = scalar_select %p839_p13, 1, 0 }
  0x15   : > { %p575_p1 = pneg %p839_p13  ;;  %s138_s28 = sshll.u32 %s752_s27, 4  ;;  %s139_s28 = int_to_ptr.vmem [resolvable:$true] %s138_s28 }
  0x16   : > { %p588_p2 = scmp.lt.s32.totalorder %s750_s15, 4  ;;  %s149_s30 = sand.u32 1, %s746_s14  }
  0x17   : > { %p848_p0 = pnand %p575_p1, %p993_p4  ;;  %s565_s5 = smul.u32 288, %s149_s30 }
  0x18   : > { %p855_p3 = pnand %p588_p2, %p818_p5  ;;  %s639_s6 = scalar_lea.vmem %s139_s28, 128 }
  0x19   : > { %p630_p7 = pneg %p848_p0  ;;  %p640_p8 = scmp.ne.s32.totalorder %s139_s28, %s639_s6 }
  0x1a   : > { %p647_p12 = scmp.lt.s32.totalorder %s139_s28, %s139_s28  ;;  %p648_p11 = scmp.lt.s32.totalorder %s639_s6, %s639_s6 }
  0x1b   : > { %p642_p9 = pnand %p640_p8, %p630_p7 }
  0x1c   : > { %p649_p1 = por %p648_p11, %p647_p12 }
  0x1d   : > { %p643_p10 = pneg %p642_p9 }
  0x1f   : > { %p650_p4 = pnand %p649_p1, %p643_p10 }
  0x21   : > { %653 = shalt.err (!%p650_p4)
}
  0x22   : > { %578 = dma.hbm_to_vmem [thread:$0]  (!%p848_p0), %s989_s1, 128, %s139_s28, [#allocation6]  }
  0x23   : > { %s563_s9 = sshll.u32 %s750_s15, 9  ;;  %s153_s10 = scalar_lea.vmem [#allocation2], %s565_s5 }
  0x24   : > { %s160_s11 = sshll.u32 %s153_s10, 4  ;;  %s870_s20 = scalar_lea.hbm %s988_s0, %s563_s9  ;;  %s872_s11 = int_to_ptr.vmem [resolvable:$true] %s160_s11 }
  0x25   : > { %s874_s22 = scalar_lea.sflag [#allocation3], %s149_s30  ;;  %s654_s27 = scalar_lea.hbm %s870_s20, 4608 }
  0x26   : > { %p655_p4 = scmp.ne.s32.totalorder %s870_s20, %s654_s27  ;;  %p656_p5 = pneg %p855_p3 }
  0x27   : > { %s659_s5 = scalar_lea.hbm %s988_s0, 18432  ;;  %p660_p2 = scmp.lt.s32.totalorder %s870_s20, %s988_s0 }
  0x28   : > { %p657_p11 = pnand %p656_p5, %p655_p4  ;;  %p661_p0 = scmp.lt.s32.totalorder %s659_s5, %s654_s27 }
  0x2a   : > { %p658_p12 = pneg %p657_p11  ;;  %p662_p7 = por %p661_p0, %p660_p2 }
  0x2c   : > { %p663_p8 = pnand %p662_p7, %p658_p12 }
  0x2e   : > { %666 = shalt.err (!%p663_p8)
}
  0x2f   : > { %s667_s30 = scalar_lea.vmem %s872_s11, 4608  ;;  %s753_s8 = smov [#allocation2]  }
  0x30   : > { %p668_p9 = scmp.ne.s32.totalorder %s872_s11, %s667_s30  ;;  %s672_s9 = sshll.u32 %s753_s8, 4  ;;  %s673_s9 = int_to_ptr.vmem [resolvable:$false] %s672_s9 }
  0x31   : > { %s674_s10 = scalar_lea.vmem %s673_s9, 9216  ;;  %p675_p4 = scmp.lt.s32.totalorder %s872_s11, %s673_s9 }
  0x32   : > { %p670_p10 = pnand %p668_p9, %p656_p5  ;;  %p676_p11 = scmp.lt.s32.totalorder %s674_s10, %s667_s30 }
  0x34   : > { %p671_p1 = pneg %p670_p10  ;;  %p677_p6 = por %p676_p11, %p675_p4 }
  0x36   : > { %p678_p13 = pnand %p677_p6, %p671_p1 }
  0x38   : > { %681 = shalt.err (!%p678_p13)
}
  0x39   : > { %s754_s17 = smov 2048   ;;  %s755_s19 = smov 512  }
  0x3a   : > { %s756_s27 = smov 32   ;;  %p1003_p5 = scmp.ne.s32.totalorder %s1000_s26, 0 }
  0x3b   : > { %582 = dma.hbm_to_vmem [thread:$0]  (!%p855_p3), %s870_s20, 4608, %s872_s11, %s874_s22, %s754_s17, %s755_s19, %s756_s27  }
  0x3c   : > { %172 = sbr.rel (%p1003_p5) target bundleno = 433 (0x1b1), region = 28  ;;  %s898_s28 = sand.u32 (!%p1003_p5), 1, %s742_s13  }
  0x3d   : > { %s566_s29 = smul.u32 (!%p1003_p5), 288, %s898_s28  ;;  %s175_s5 = scalar_lea.sflag (!%p1003_p5), [#allocation3], %s898_s28 }
  0x3e   : > { %p1004_p6 = scmp.ne.s32.totalorder (!%p1003_p5), %s997_s23, 0 }
  0x3f   : > { %s902_s6 = scalar_lea.vmem (!%p1003_p5), [#allocation2], %s566_s29 }
  0x41   : > { %725 = dma.done.wait (%p1004_p6), %s175_s5, 4608  }
  0x42   : > { %727 = vsyncadd (%p1004_p6), %s175_s5, 4294962688  ;;  %p1005_p13 = scmp.eq.s32.totalorder %s800_s16, 0 }
  0x44   : > { %729 = dma.done.wait (%p1005_p13), [#allocation6], 128   ;;  %p1006_p3 = pmov %p1005_p13 }
  0x45   : > { %v757_v0 = vmov 0.0   ;;  %v249_v1 = vld [vmem:[%s902_s6 + $0x108] sm:$0xff]  ;;  %v248_v2 = vld [vmem:[%s902_s6 + $0x100] sm:$0xff]  ;;  %v251_v4 = vld [vmem:[%s902_s6 + $0x118] sm:$0xff]  ;;  %vm252_vm0 = vcmask 588800   ;;  %s554_s23 = sshll.u32 %s898_s28, 5 }
  0x46   : > { %731 = vsyncadd (%p1006_p3), [#allocation6], 4294967168  ;;  %320 = vmatprep.mubr.f32.mxu0 %v757_v0  ;;  %391 = vmatprep.mubr.f32.mxu1 %v757_v0  ;;  %v245_v3 = vld [vmem:[%s902_s6 + $0xe8] sm:$0xff]  ;;  %v244_v5 = vld [vmem:[%s902_s6 + $0xe0] sm:$0xff]  ;;  %s202_s26 = scalar_lea.vmem [#allocation7], %s554_s23  ;;  %s564_s4 = sshll.u32 %s800_s16, 9 }
  0x47   : > { %270 = vmatprep.subr.mxu0 %v249_v1  ;;  %v250_v6 = vld [vmem:[%s902_s6 + $0x110] sm:$0xff]  ;;  %341 = vmatprep.subr.mxu1 %v251_v4  ;;  %v241_v7 = vld [vmem:[%s902_s6 + $0xc8] sm:$0xff]  ;;  %v247_v8 = vld [vmem:[%s902_s6 + $0xf8] sm:$0xff]  ;;  %s439_s11 = sshll.u32 %s202_s26, 4  ;;  %s437_s7 = scalar_lea.hbm %s990_s2, %s564_s4  ;;  %s440_s11 = int_to_ptr.vmem [resolvable:$true] %s439_s11 }
  0x48   : > { %271 = vmatpush1.msra.mxu0 %v248_v2  ;;  %342 = vmatpush1.msra.mxu1 %v250_v6  ;;  %v240_v9 = vld [vmem:[%s902_s6 + $0xc0] sm:$0xff]  ;;  %v246_v10 = vld [vmem:[%s902_s6 + $0xf0] sm:$0xff]  ;;  %v243_v11 = vld [vmem:[%s902_s6 + $0xd8] sm:$0xff]  ;;  %s421_s30 = scalar_lea.sflag [#allocation4], %s898_s28  ;;  %s682_s8 = scalar_lea.vmem %s440_s11, 512 }
  0x49   : > { %272 = vmatprep.subr.mxu0 %v245_v3  ;;  %343 = vmatprep.subr.mxu1 %v247_v8  ;;  %v237_v12 = vld [vmem:[%s902_s6 + $0xa8] sm:$0xff]  ;;  %v242_v13 = vld [vmem:[%s902_s6 + $0xd0] sm:$0xff]  ;;  %v236_v14 = vld [vmem:[%s902_s6 + $0xa0] sm:$0xff]  ;;  %p683_p12 = scmp.ne.s32.totalorder %s440_s11, %s682_s8  ;;  %p1007_p2 = scmp.ne.s32.totalorder %s998_s24, 0 }
  0x4a   : > { %273 = vmatpush1.msra.mxu0 %v244_v5  ;;  %344 = vmatpush1.msra.mxu1 %v246_v10  ;;  %v239_v15 = vld [vmem:[%s902_s6 + $0xb8] sm:$0xff]  ;;  %v233_v16 = vld [vmem:[%s902_s6 + $0x88] sm:$0xff]  ;;  %v238_v17 = vld [vmem:[%s902_s6 + $0xb0] sm:$0xff]  ;;  %s758_s9 = smov [#allocation7]  }
  0x4b   : > { %274 = vmatprep.subr.mxu0 %v241_v7  ;;  %345 = vmatprep.subr.mxu1 %v243_v11  ;;  %v232_v18 = vld [vmem:[%s902_s6 + $0x80] sm:$0xff]  ;;  %v235_v19 = vld [vmem:[%s902_s6 + $0x98] sm:$0xff]  ;;  %v229_v20 = vld [vmem:[%s902_s6 + $0x68] sm:$0xff]  ;;  %p684_p0 = pnand %p683_p12, %p1007_p2  ;;  %s686_s10 = sshll.u32 %s758_s9, 4  ;;  %s687_s10 = int_to_ptr.vmem [resolvable:$false] %s686_s10 }
  0x4c   : > { %275 = vmatpush1.msra.mxu0 %v240_v9  ;;  %346 = vmatpush1.msra.mxu1 %v242_v13  ;;  %v234_v21 = vld [vmem:[%s902_s6 + $0x90] sm:$0xff]  ;;  %v228_v22 = vld [vmem:[%s902_s6 + $0x60] sm:$0xff]  ;;  %v231_v23 = vld [vmem:[%s902_s6 + $0x78] sm:$0xff]  ;;  %s688_s17 = scalar_lea.vmem %s687_s10, 1024  ;;  %p689_p8 = scmp.lt.s32.totalorder %s440_s11, %s687_s10 }
  0x4d   : > { %276 = vmatprep.subr.mxu0 %v237_v12  ;;  %347 = vmatprep.subr.mxu1 %v239_v15  ;;  %v225_v24 = vld [vmem:[%s902_s6 + $0x48] sm:$0xff]  ;;  %v230_v25 = vld [vmem:[%s902_s6 + $0x70] sm:$0xff]  ;;  %v224_v26 = vld [vmem:[%s902_s6 + $0x40] sm:$0xff]  ;;  %p685_p7 = pneg %p684_p0  ;;  %p690_p9 = scmp.lt.s32.totalorder %s688_s17, %s682_s8 }
  0x4e   : > { %277 = vmatpush1.msra.mxu0 %v236_v14  ;;  %348 = vmatpush1.msra.mxu1 %v238_v17  ;;  %v227_v27 = vld [vmem:[%s902_s6 + $0x58] sm:$0xff]  ;;  %v221_v28 = vld [vmem:[%s902_s6 + $0x28] sm:$0xff]  ;;  %v226_v29 = vld [vmem:[%s902_s6 + $0x50] sm:$0xff] }
  0x4f   : > { %278 = vmatprep.subr.mxu0 %v233_v16  ;;  %349 = vmatprep.subr.mxu1 %v235_v19  ;;  %v220_v30 = vld [vmem:[%s902_s6 + $0x20] sm:$0xff]  ;;  %v223_v31 = vld [vmem:[%s902_s6 + $0x38] sm:$0xff]  ;;  %v217_v32 = vld [vmem:[%s902_s6 + $0x8] sm:$0xff]  ;;  %p691_p10 = por %p690_p9, %p689_p8 }
  0x50   : > { %279 = vmatpush1.msra.mxu0 %v232_v18  ;;  %350 = vmatpush1.msra.mxu1 %v234_v21  ;;  %v222_v33 = vld [vmem:[%s902_s6 + $0x30] sm:$0xff]  ;;  %v216_v34 = vld [vmem:[%s902_s6] sm:$0xff]  ;;  %v219_v35 = vld [vmem:[%s902_s6 + $0x18] sm:$0xff] }
  0x51   : > { %280 = vmatprep.subr.mxu0 %v229_v20  ;;  %351 = vmatprep.subr.mxu1 %v231_v23  ;;  %v215_v36 = vld [vmem:[#allocation5] sm:$0xff]  ;;  %v218_v37 = vld [vmem:[%s902_s6 + $0x10] sm:$0xff]  ;;  %p692_p1 = pnand %p691_p10, %p685_p7 }
  0x52   : > { %281 = vmatpush1.msra.mxu0 %v228_v22  ;;  %352 = vmatpush1.msra.mxu1 %v230_v25 }
  0x53   : > { %282 = vmatprep.subr.mxu0 %v225_v24  ;;  %353 = vmatprep.subr.mxu1 %v227_v27 }
  0x54   : > { %283 = vmatpush1.msra.mxu0 %v224_v26  ;;  %354 = vmatpush1.msra.mxu1 %v226_v29 }
  0x55   : > { %284 = vmatprep.subr.mxu0 %v221_v28  ;;  %355 = vmatprep.subr.mxu1 %v223_v31 }
  0x56   : > { %285 = vmatpush1.msra.mxu0 %v220_v30  ;;  %356 = vmatpush1.msra.mxu1 %v222_v33 }
  0x57   : > { %286 = vmatprep.subr.mxu0 %v217_v32  ;;  %357 = vmatprep.subr.mxu1 %v219_v35 }
  0x58   : > { %287 = vmatpush1.msra.mxu0 %v216_v34  ;;  %358 = vmatpush1.msra.mxu1 %v218_v37 }
  0x59   : > { %556 = vmatmul.mubr.msk.f32.vlgmr.msra.gmra.mxu0 %vm252_vm0, %v215_v36  ;;  %557 = vmatmul.mubr.msk.f32.vlgmr.msra.gmra.mxu1 %vm252_vm0, %v215_v36 }
 0x119   : > { %v322_v38 = vpop.f32.mrf.mxu0  ;;  %v393_v39 = vpop.f32.mrf.mxu1 }
 0x11a   : > { %398 = vst [vmem:[%s202_s26] sm:$0xff] %v322_v38  ;;  %400 = vst [vmem:[%s202_s26 + $0x10] sm:$0xff] %v393_v39  ;;  %v409_v41 = vmul.f32 %v322_v38, %v322_v38  ;;  %v411_v44 = vmul.f32 %v393_v39, %v393_v39 }
 0x11b   : > { %v324_v40 = vpop.f32.mrf.mxu0  ;;  %v395_v45 = vpop.f32.mrf.mxu1 }
 0x11c   : > { %399 = vst [vmem:[%s202_s26 + $0x8] sm:$0xff] %v324_v40  ;;  %v402_v42 = vadd.f32 %v324_v40, %v322_v38  ;;  %v410_v43 = vmul.f32 %v324_v40, %v324_v40  ;;  %401 = vst [vmem:[%s202_s26 + $0x18] sm:$0xff] %v395_v45  ;;  %v412_v50 = vmul.f32 %v395_v45, %v395_v45 }
 0x11e   : > { %v413_v46 = vadd.f32 %v410_v43, %v409_v41  ;;  %v403_v47 = vadd.f32 %v402_v42, %v393_v39 }
 0x120   : > { %v404_v48 = vadd.f32 %v403_v47, %v395_v45  ;;  %v414_v49 = vadd.f32 %v413_v46, %v411_v44 }
 0x122   : > { %405 = vadd.xlane.f32.xlu0 %v404_v48  ;;  %v415_v51 = vadd.f32 %v414_v49, %v412_v50 }
 0x126   : > { %416 = vadd.xlane.f32.xlu0 %v415_v51 }
 0x127   : > { %695 = shalt.err (!%p692_p1)
}
 0x128   : > { %s696_s19 = scalar_lea.hbm %s437_s7, 512  ;;  %s700_s29 = scalar_lea.hbm %s990_s2, 2048 }
 0x129   : > { %p697_p4 = scmp.ne.s32.totalorder %s437_s7, %s696_s19  ;;  %p701_p6 = scmp.lt.s32.totalorder %s437_s7, %s990_s2 }
 0x12a   : > { %p702_p13 = scmp.lt.s32.totalorder %s700_s29, %s696_s19 }
 0x12b   : > { %p698_p11 = pnand %p697_p4, %p1007_p2 }
 0x12c   : > { %p703_p3 = por %p702_p13, %p701_p6 }
 0x12d   : > { %p699_p5 = pneg %p698_p11 }
 0x12f   : > { %p704_p12 = pnand %p703_p3, %p699_p5 }
 0x131   : > { %707 = shalt.err (!%p704_p12)
}
 0x132   : > { %573 = dma.vmem_to_hbm [thread:$0]  (%p1007_p2), %s440_s11, 512, %s437_s7, %s421_s30   ;;  %vm407_vm1 = vcmask 7168   ;;  %vm418_vm2 = vcmask 15368  }
 0x133   : > { %p211_p0 = scmp.lt.s32.totalorder %s800_s16, 3 }
 0x135   : > { %s1014_s16 = smov (!%p211_p0, %s800_s16), 3 }
 0x136   : > { %s555_s23 = sshll.u32 %s1014_s16, 3 }
 0x137   : > { %s214_s20 = scalar_lea.vmem %s991_s3, %s555_s23 }
 0x1ab   : > { %v406_v52 = vpop.xlane.xlu0 %405 }
 0x1ac   : > { %408 = vst.msk [vmem:[%s214_s20] sm:$0xff] %vm407_vm1, %v406_v52 }
 0x1af   : > { %v417_v53 = vpop.xlane.xlu0 %416 }
 0x1b0   : > { %419 = vst.msk [vmem:[%s214_s20] sm:$0xff] %vm418_vm2, %v417_v53 }
 0x1b1 PF: > { %p590_p7 = scmp.ge.s32.totalorder %s750_s15, 2  ;;  %s454_s24 = sand.u32 1, %s738_s12  }
 0x1b2   : > { %p1008_p2 = scmp.ne.s32.totalorder %s999_s25, 0  ;;  %s455_s16 = scalar_lea.sflag [#allocation4], %s454_s24 }
 0x1b4   : > { %p584_p8 = pnand %p590_p7, %p1008_p2 }
 0x1b6   : > { %p585_p9 = pneg %p584_p8 }
 0x1b8   : > { %733 = dma.done.wait (%p585_p9), %s455_s16, 512  }
 0x1b9   : > { %735 = vsyncadd (%p585_p9), %s455_s16, 4294966784  ;;  %p18_p10 = scmp.ge.s32.totalorder %s804_s18, 6   ;;  %s1009_s12 = smov %s742_s13 }
 0x1ba   : > { %s1010_s13 = smov %s746_s14  ;;  %s1011_s14 = smov %s816_s21 }
 0x1bb   : > { %s1012_s15 = smov %s804_s18  ;;  %20 = sbr.rel (!%p18_p10) target bundleno = 6 (0x6), region = 89 }
 0x1c0   :  { %467 = vsyncpa [#allocation3], 1 }
 0x1c1   :  { %469 = vsyncpa [#allocation3 + $0x1], 1 }
 0x1c2   :  { %470 = vsyncpa [#allocation6], 1 }
 0x1c3   :  { %471 = vsyncpa [#allocation4], 1 }
 0x1c4   :  { %473 = vsyncpa [#allocation4 + $0x1], 1 }

</bundles_post_ra>
